<compile_context>
chip_gen: v5e
topology: v5e:2x2
jax: 0.10.0
libtpu: 0.0.40
codegen_flags: <defaults>
</compile_context>

<pallas_src>
import jax
import jax.numpy as jnp
from jax.experimental import pallas as pl
from jax.experimental.pallas import tpu as pltpu


def _round_up(x: int, m: int) -> int:
    return ((x + m - 1) // m) * m


def _linear_kernel(x_ref, w_ref, b_ref, o_ref):
    # x_ref: (TB, D) bf16   w_ref: (D, Cp) bf16   b_ref: (1, Cp) f32   o_ref: (TB, Cp) f32
    acc = jnp.dot(x_ref[...], w_ref[...], preferred_element_type=jnp.float32)
    o_ref[...] = acc + b_ref[...]


def prepare_params(weight, bias, *, c_pad_to: int = 128):
    """One-time parameter preparation (do this OUTSIDE the per-call forward).

    Args:
        weight: (num_classes, 3*H*W) float32, PyTorch nn.Linear layout.
        bias:   (num_classes,) float32.

    Returns:
        w_pad: (D, Cp) bfloat16, pre-transposed and zero-padded on the class dim.
        b_pad: (1, Cp) float32, zero-padded.
    """
    c, d = weight.shape
    cp = _round_up(max(c, c_pad_to), 128)
    w_pad = jnp.zeros((d, cp), jnp.bfloat16)
    w_pad = w_pad.at[:, :c].set(weight.T.astype(jnp.bfloat16))
    b_pad = jnp.zeros((1, cp), jnp.float32)
    b_pad = b_pad.at[0, :c].set(bias.astype(jnp.float32))
    return w_pad, b_pad


def linear_classifier_forward(x, w_pad, b_pad, num_classes: int):
    """
    Args:
        x:          (b, 3, H, W) float32 image batch (NCHW, like PyTorch).
        w_pad:      (D, Cp) bfloat16 from prepare_params.
        b_pad:      (1, Cp) float32 from prepare_params.
        num_classes: number of real (unpadded) classes.

    Returns:
        (b, num_classes) float32 logits.
    """
    b = x.shape[0]
    d = x.shape[1] * x.shape[2] * x.shape[3]
    cp = w_pad.shape[1]

    # Flatten exactly like torch .view(b, -1), cast inputs to bf16 for the MXU.
    x_flat = x.reshape(b, d).astype(jnp.bfloat16)

    # Batch tile: 256 rows for real batches (full MXU passes, fits v7x VMEM),
    # otherwise pad the tiny batch up to the 8-row sublane granule.
    tb = 256 if b >= 256 else _round_up(b, 8)
    pb = _round_up(b, tb)
    if pb != b:
        x_flat = jnp.pad(x_flat, ((0, pb - b), (0, 0)))

    out = pl.pallas_call(
        _linear_kernel,
        out_shape=jax.ShapeDtypeStruct((pb, cp), jnp.float32),
        grid_spec=pltpu.PrefetchScalarGridSpec(
            num_scalar_prefetch=0,
            grid=(pb // tb,),
            in_specs=[
                # x: one batch tile per grid step (pipelined HBM->VMEM DMA).
                pl.BlockSpec((tb, d), lambda i: (i, 0)),
                # weight / bias: constant block index -> VMEM-resident across tiles.
                pl.BlockSpec((d, cp), lambda i: (0, 0)),
                pl.BlockSpec((1, cp), lambda i: (0, 0)),
            ],
            out_specs=pl.BlockSpec((tb, cp), lambda i: (i, 0)),
        ),
        compiler_params=pltpu.CompilerParams(
            dimension_semantics=("parallel",),      # megacore split of batch tiles (v7x)
            vmem_limit_bytes=48 * 1024 * 1024,      # sized under v7x's 64 MiB VMEM
        ),
    )(x_flat, w_pad, b_pad)

    # Drop batch / class padding.
    return out[:b, :num_classes]


if __name__ == "__main__":
    # Small shapes consistent with the module: 3 channels, h=w=16, 6 classes.
    H, W, NUM_CLASSES = 16, 16, 6
    B = 2
    D = 3 * H * W

    key = jax.random.PRNGKey(0)
    kx, kw, kb = jax.random.split(key, 3)

    # nn.Linear-style init: uniform(-1/sqrt(D), 1/sqrt(D)).
    bound = 1.0 / (D ** 0.5)
    weight = jax.random.uniform(kw, (NUM_CLASSES, D), jnp.float32, -bound, bound)
    bias = jax.random.uniform(kb, (NUM_CLASSES,), jnp.float32, -bound, bound)
    x = jax.random.normal(kx, (B, 3, H, W), jnp.float32)

    # One-time param prep (transpose + pad + bf16 cast), then the kernel call.
    w_pad, b_pad = prepare_params(weight, bias)
    logits = linear_classifier_forward(x, w_pad, b_pad, NUM_CLASSES)
    jax.block_until_ready(logits)

    # Reference in plain f32 JAX (same math as torch.nn.Linear); loosened
    # tolerance because kernel inputs are bf16 (f32 accumulation).
    ref = x.reshape(B, -1) @ weight.T + bias
    assert logits.shape == (B, NUM_CLASSES), logits.shape
    assert jnp.allclose(logits, ref, atol=2e-2, rtol=2e-2), (
        float(jnp.max(jnp.abs(logits - ref)))
    )

    print("KERNEL_OK")
</pallas_src>

<mosaic_0001>
module attributes {stable_mosaic.version = 11 : i64} {
  func.func @_linear_kernel(%arg0: i32, %arg1: memref<8x768xbf16, #tpu.memory_space<vmem>>, %arg2: memref<768x128xbf16, #tpu.memory_space<vmem>>, %arg3: memref<1x128xf32, #tpu.memory_space<vmem>>, %arg4: memref<8x128xf32, #tpu.memory_space<vmem>>) attributes {dimension_semantics = [#tpu.dimension_semantics<parallel>], iteration_bounds = array<i64: 1>, scalar_prefetch = 0 : i64, scratch_operands = 0 : i64, tpu.core_type = #tpu.core_type<tc>, window_params = [{transform_indices = @transform_0, window_bounds = array<i64: 8, 768>}, {pipeline_mode = #tpu.pipeline_mode<synchronous>, transform_indices = @transform_1, window_bounds = array<i64: 768, 128>}, {pipeline_mode = #tpu.pipeline_mode<synchronous>, transform_indices = @transform_2, window_bounds = array<i64: 1, 128>}, {transform_indices = @transform_3, window_bounds = array<i64: 8, 128>}]} {
    %c0 = arith.constant 0 : index
    %c0_0 = arith.constant 0 : index
    %0 = vector.load %arg1[%c0, %c0_0] : memref<8x768xbf16, #tpu.memory_space<vmem>>, vector<8x768xbf16>
    %c0_1 = arith.constant 0 : index
    %c0_2 = arith.constant 0 : index
    %1 = vector.load %arg2[%c0_1, %c0_2] : memref<768x128xbf16, #tpu.memory_space<vmem>>, vector<768x128xbf16>
    %cst = arith.constant dense<0.000000e+00> : vector<8x128xf32>
    %2 = tpu.matmul %0, %1, %cst {dimension_numbers = #tpu.dot_dimension_numbers<[1], [0], [0], [1], [0, 0, 1, 1], [], []>} : vector<8x768xbf16>, vector<768x128xbf16>, vector<8x128xf32> -> vector<8x128xf32>
    %c0_3 = arith.constant 0 : index
    %c0_4 = arith.constant 0 : index
    %3 = vector.load %arg3[%c0_3, %c0_4] : memref<1x128xf32, #tpu.memory_space<vmem>>, vector<1x128xf32>
    %4 = vector.broadcast %3 : vector<1x128xf32> to vector<8x128xf32>
    %5 = arith.addf %2, %4 : vector<8x128xf32>
    %c0_5 = arith.constant 0 : index
    %c0_6 = arith.constant 0 : index
    %6 = vector.load %arg4[%c0_5, %c0_6] : memref<8x128xf32, #tpu.memory_space<vmem>>, vector<8x128xf32>
    tpu.vector_store %arg4[%c0_5, %c0_6], %5 {strides = array<i32>} : memref<8x128xf32, #tpu.memory_space<vmem>>, vector<8x128xf32>,
    return
  }
  func.func @transform_0(%arg0: i32) -> (i32, i32) {
    %c0_i32 = arith.constant 0 : i32
    %c0_i32_0 = arith.constant 0 : i32
    return %arg0, %c0_i32 : i32, i32
  }
  func.func @transform_1(%arg0: i32) -> (i32, i32) {
    %c0_i32 = arith.constant 0 : i32
    %c0_i32_0 = arith.constant 0 : i32
    %c0_i32_1 = arith.constant 0 : i32
    return %c0_i32, %c0_i32_0 : i32, i32
  }
  func.func @transform_2(%arg0: i32) -> (i32, i32) {
    %c0_i32 = arith.constant 0 : i32
    %c0_i32_0 = arith.constant 0 : i32
    %c0_i32_1 = arith.constant 0 : i32
    return %c0_i32, %c0_i32_0 : i32, i32
  }
  func.func @transform_3(%arg0: i32) -> (i32, i32) {
    %c0_i32 = arith.constant 0 : i32
    %c0_i32_0 = arith.constant 0 : i32
    return %arg0, %c0_i32 : i32, i32
  }
}

</mosaic_0001>

<bundles_post_ra>
// kernel: tpu_custom_call.1
= control target key start
LH: loop header
LB: loop body
LE: loop exit
PB: predicated region body
PF: predicated region fallthrough
CT: control target
= control target key end

     0   :  { %8 = vsyncpa [#allocation3], 0  ;;  %s915_s0 = inlined_call_operand.hbm [shape: bf16[8,768], index: 0, kind: input, shape index: {}]   ;;  %s916_s1 = inlined_call_operand.hbm [shape: bf16[768,128], index: 1, kind: input, shape index: {}]   ;;  %s917_s2 = inlined_call_operand.vmem [shape: f32[1,128], index: 2, kind: input, shape index: {}]   ;;  %s918_s3 = inlined_call_operand.hbm [shape: f32[8,128], index: 3, kind: output, shape index: {}]  }
   0x1   :  { %9 = vsyncpa [#allocation6], 0 }
   0x2   :  { %10 = vsyncpa [#allocation4], 0  ;;  %s16_s14 = sshll.u32 %s915_s0, 4  ;;  %s878_s15 = smov [#allocation2]   ;;  %s17_s14 = int_to_ptr.hbm [resolvable:$true] %s16_s14 }
   0x3   :  { %s18_s16 = sshll.u32 %s878_s15, 4  ;;  %s26_s19 = sshll.u32 %s916_s1, 4  ;;  %s19_s16 = int_to_ptr.vmem [resolvable:$true] %s18_s16  ;;  %s27_s19 = int_to_ptr.hbm [resolvable:$true] %s26_s19 }
   0x4   :  { %21 = dma.hbm_to_vmem [thread:$0]  %s17_s14, 384, %s19_s16, [#allocation3]  }
   0x5   :  { %s879_s20 = smov [#allocation5]   ;;  %s880_s22 = smov 64  }
   0x6   :  { %s28_s21 = sshll.u32 %s879_s20, 4  ;;  %s881_s23 = smov 4   ;;  %s29_s21 = int_to_ptr.vmem [resolvable:$true] %s28_s21 }
   0x7   :  { %34 = dma.hbm_to_vmem [thread:$0]  %s27_s19, 6144, %s29_s21, [#allocation6], %s880_s22, %s880_s22, %s881_s23  }
   0x8   :  { %872 = dma.done.wait [#allocation3], 384  }
   0x9   :  { %873 = vsyncadd [#allocation3], 4294966912 }
   0xa   :  { %874 = dma.done.wait [#allocation6], 6144  }
   0xb   :  { %875 = vsyncadd [#allocation6], 4294961152  ;;  %v753_v0 = vld [vmem:[#allocation5 + $0x38] sm:$0xff]  ;;  %v752_v2 = vld [vmem:[#allocation5 + $0x30] sm:$0xff]  ;;  %s882_s24 = smov [#allocation7]   ;;  %s543_s28 = sshll.u32 %s918_s3, 4  ;;  %s544_s28 = int_to_ptr.hbm [resolvable:$true] %s543_s28 }
   0xc   :  { %v761_v1 = vld [vmem:[#allocation5 + $0x78] sm:$0xff]  ;;  %457 = vmatpush.bf16.msra.mxu0 %v753_v0  ;;  %v760_v3 = vld [vmem:[#allocation5 + $0x70] sm:$0xff]  ;;  %v751_v8 = vld [vmem:[#allocation5 + $0x28] sm:$0xff]  ;;  %s541_s25 = sshll.u32 %s882_s24, 4  ;;  %s542_s25 = int_to_ptr.vmem [resolvable:$true] %s541_s25 }
   0xd   :  { %470 = vmatpush.bf16.msra.mxu1 %v761_v1  ;;  %v769_v4 = vld [vmem:[#allocation5 + $0xb8] sm:$0xff]  ;;  %v768_v6 = vld [vmem:[#allocation5 + $0xb0] sm:$0xff]  ;;  %v759_v9 = vld [vmem:[#allocation5 + $0x68] sm:$0xff] }
   0xe   :  { %v777_v5 = vld [vmem:[#allocation5 + $0xf8] sm:$0xff]  ;;  %483 = vmatpush.bf16.msra.mxu2 %v769_v4  ;;  %v776_v7 = vld [vmem:[#allocation5 + $0xf0] sm:$0xff]  ;;  %v767_v10 = vld [vmem:[#allocation5 + $0xa8] sm:$0xff] }
   0xf   :  { %496 = vmatpush.bf16.msra.mxu3 %v777_v5  ;;  %v775_v11 = vld [vmem:[#allocation5 + $0xe8] sm:$0xff]  ;;  %v750_v12 = vld [vmem:[#allocation5 + $0x20] sm:$0xff]  ;;  %v749_v16 = vld [vmem:[#allocation5 + $0x18] sm:$0xff] }
  0x10   :  { %458 = vmatpush.bf16.msra.mxu0 %v752_v2  ;;  %v758_v13 = vld [vmem:[#allocation5 + $0x60] sm:$0xff]  ;;  %v757_v17 = vld [vmem:[#allocation5 + $0x58] sm:$0xff]  ;;  %v748_v20 = vld [vmem:[#allocation5 + $0x10] sm:$0xff] }
  0x11   :  { %471 = vmatpush.bf16.msra.mxu1 %v760_v3  ;;  %v766_v14 = vld [vmem:[#allocation5 + $0xa0] sm:$0xff]  ;;  %v765_v18 = vld [vmem:[#allocation5 + $0x98] sm:$0xff]  ;;  %v756_v21 = vld [vmem:[#allocation5 + $0x50] sm:$0xff] }
  0x12   :  { %484 = vmatpush.bf16.msra.mxu2 %v768_v6  ;;  %v774_v15 = vld [vmem:[#allocation5 + $0xe0] sm:$0xff]  ;;  %v773_v19 = vld [vmem:[#allocation5 + $0xd8] sm:$0xff]  ;;  %v764_v22 = vld [vmem:[#allocation5 + $0x90] sm:$0xff] }
  0x13   :  { %497 = vmatpush.bf16.msra.mxu3 %v776_v7  ;;  %v772_v23 = vld [vmem:[#allocation5 + $0xd0] sm:$0xff]  ;;  %v747_v24 = vld [vmem:[#allocation5 + $0x8] sm:$0xff]  ;;  %v746_v32 = vld [vmem:[#allocation5] sm:$0xff] }
  0x14   :  { %459 = vmatpush.bf16.msra.mxu0 %v751_v8  ;;  %v755_v25 = vld [vmem:[#allocation5 + $0x48] sm:$0xff]  ;;  %v46_v31 = vld [vmem:[#allocation2 + $0x8] sm:$0xff]  ;;  %v754_v33 = vld [vmem:[#allocation5 + $0x40] sm:$0xff] }
  0x15   :  { %472 = vmatpush.bf16.msra.mxu1 %v759_v9  ;;  %v45_v26 = vld [vmem:[#allocation2] sm:$0xff]  ;;  %v785_v34 = vld [vmem:[#allocation5 + $0x138] sm:$0xff]  ;;  %v762_v36 = vld [vmem:[#allocation5 + $0x80] sm:$0xff]  ;;  %v153_v38 = vunpack.c.l.b16 %v46_v31  ;;  %v154_v39 = vunpack.c.h.b16 %v46_v31 }
  0x16   :  { %485 = vmatpush.bf16.msra.mxu2 %v767_v10  ;;  %v763_v27 = vld [vmem:[#allocation5 + $0x88] sm:$0xff]  ;;  %v151_v29 = vunpack.c.l.b16 %v45_v26  ;;  %v152_v30 = vunpack.c.h.b16 %v45_v26  ;;  %v793_v35 = vld [vmem:[#allocation5 + $0x178] sm:$0xff]  ;;  %v770_v37 = vld [vmem:[#allocation5 + $0xc0] sm:$0xff] }
  0x17   :  { %498 = vmatpush.bf16.msra.mxu3 %v775_v11  ;;  %v771_v28 = vld [vmem:[#allocation5 + $0xc8] sm:$0xff]  ;;  %v784_v42 = vld [vmem:[#allocation5 + $0x130] sm:$0xff]  ;;  %v159_v44 = vpack.c.b16 %v153_v38, %v153_v38  ;;  %v160_v45 = vpack.c.b16 %v154_v39, %v154_v39  ;;  %v782_v48 = vld [vmem:[#allocation5 + $0x120] sm:$0xff] }
  0x18   :  { %460 = vmatpush.bf16.msra.mxu0 %v750_v12  ;;  %v157_v40 = vpack.c.b16 %v151_v29, %v151_v29  ;;  %v158_v41 = vpack.c.b16 %v152_v30, %v152_v30  ;;  %v792_v43 = vld [vmem:[#allocation5 + $0x170] sm:$0xff]  ;;  %v783_v46 = vld [vmem:[#allocation5 + $0x128] sm:$0xff]  ;;  %v790_v49 = vld [vmem:[#allocation5 + $0x160] sm:$0xff] }
  0x19   :  { %473 = vmatpush.bf16.msra.mxu1 %v758_v13  ;;  %v791_v47 = vld [vmem:[#allocation5 + $0x168] sm:$0xff]  ;;  %v781_v50 = vld [vmem:[#allocation5 + $0x118] sm:$0xff]  ;;  %v780_v52 = vld [vmem:[#allocation5 + $0x110] sm:$0xff] }
  0x1a   :  { %486 = vmatpush.bf16.msra.mxu2 %v766_v14  ;;  %v789_v51 = vld [vmem:[#allocation5 + $0x158] sm:$0xff]  ;;  %v788_v53 = vld [vmem:[#allocation5 + $0x150] sm:$0xff]  ;;  %v779_v54 = vld [vmem:[#allocation5 + $0x108] sm:$0xff] }
  0x1b   :  { %499 = vmatpush.bf16.msra.mxu3 %v774_v15  ;;  %v787_v55 = vld [vmem:[#allocation5 + $0x148] sm:$0xff]  ;;  %v47_v56 = vld [vmem:[#allocation2 + $0x10] sm:$0xff]  ;;  %v778_v59 = vld [vmem:[#allocation5 + $0x100] sm:$0xff] }
  0x1c   :  { %461 = vmatpush.bf16.msra.mxu0 %v749_v16  ;;  %v155_v57 = vunpack.c.l.b16 %v47_v56  ;;  %v156_v58 = vunpack.c.h.b16 %v47_v56  ;;  %v786_v60 = vld [vmem:[#allocation5 + $0x140] sm:$0xff]  ;;  %v799_v5 = vld [vmem:[%s917_s2] ss:$0 sm:$0xff] }
  0x1d   :  { %474 = vmatpush.bf16.msra.mxu1 %v757_v17 }
  0x1e   :  { %487 = vmatpush.bf16.msra.mxu2 %v765_v18  ;;  %v161_v61 = vpack.c.b16 %v155_v57, %v155_v57  ;;  %v162_v62 = vpack.c.b16 %v156_v58, %v156_v58 }
  0x1f   :  { %500 = vmatpush.bf16.msra.mxu3 %v773_v19 }
  0x20   :  { %462 = vmatpush.bf16.msra.mxu0 %v748_v20 }
  0x21   :  { %475 = vmatpush.bf16.msra.mxu1 %v756_v21 }
  0x22   :  { %488 = vmatpush.bf16.msra.mxu2 %v764_v22 }
  0x23   :  { %501 = vmatpush.bf16.msra.mxu3 %v772_v23 }
  0x24   :  { %463 = vmatpush.bf16.msra.mxu0 %v747_v24 }
  0x25   :  { %476 = vmatpush.bf16.msra.mxu1 %v755_v25 }
  0x26   :  { %489 = vmatpush.bf16.msra.mxu2 %v763_v27 }
  0x27   :  { %502 = vmatpush.bf16.msra.mxu3 %v771_v28 }
  0x28   :  { %464 = vmatpush.bf16.msra.mxu0 %v746_v32 }
  0x29   :  { %477 = vmatpush.bf16.msra.mxu1 %v754_v33 }
  0x2a   :  { %490 = vmatpush.bf16.msra.mxu2 %v762_v36 }
  0x2b   :  { %503 = vmatpush.bf16.msra.mxu3 %v770_v37  ;;  %465 = vmatmul.bf16.vlgmr.msra.gmra.mxu0 %v157_v40 }
  0x2c   :  { %509 = vmatpush.bf16.msrb.mxu0 %v785_v34  ;;  %478 = vmatmul.bf16.vlgmr.msra.gmra.mxu1 %v158_v41 }
  0x2d   :  { %522 = vmatpush.bf16.msrb.mxu1 %v793_v35  ;;  %491 = vmatmul.bf16.vlgmr.msra.gmra.mxu2 %v159_v44 }
  0x2e   :  { %504 = vmatmul.bf16.vlgmr.msra.gmra.mxu3 %v160_v45 }
  0x30   :  { %510 = vmatpush.bf16.msrb.mxu0 %v784_v42 }
  0x31   :  { %523 = vmatpush.bf16.msrb.mxu1 %v792_v43 }
  0x34   :  { %511 = vmatpush.bf16.msrb.mxu0 %v783_v46 }
  0x35   :  { %524 = vmatpush.bf16.msrb.mxu1 %v791_v47 }
  0x38   :  { %512 = vmatpush.bf16.msrb.mxu0 %v782_v48 }
  0x39   :  { %525 = vmatpush.bf16.msrb.mxu1 %v790_v49 }
  0x3c   :  { %513 = vmatpush.bf16.msrb.mxu0 %v781_v50 }
  0x3d   :  { %526 = vmatpush.bf16.msrb.mxu1 %v789_v51 }
  0x40   :  { %514 = vmatpush.bf16.msrb.mxu0 %v780_v52 }
  0x41   :  { %527 = vmatpush.bf16.msrb.mxu1 %v788_v53 }
  0x44   :  { %515 = vmatpush.bf16.msrb.mxu0 %v779_v54 }
  0x45   :  { %528 = vmatpush.bf16.msrb.mxu1 %v787_v55 }
  0x48   :  { %516 = vmatpush.bf16.msrb.mxu0 %v778_v59 }
  0x49   :  { %529 = vmatpush.bf16.msrb.mxu1 %v786_v60 }
  0x4b   :  { %517 = vmatmul.bf16.vlgmr.msrb.gmra.mxu0 %v161_v61 }
  0x4c   :  { %530 = vmatmul.bf16.vlgmr.msrb.gmra.mxu1 %v162_v62 }
  0xa8   :  { %v466_v63 = vpop.f32.mrf.mxu0 }
  0xa9   :  { %v479_v0 = vpop.f32.mrf.mxu1  ;;  %v467_v6 = vadd.f32 %v799_v5, %v466_v63 }
  0xab   :  { %v480_v9 = vadd.f32 %v479_v0, %v467_v6 }
  0xb0   :  { %v468_v1 = vpop.f32.mrf.mxu0  ;;  %v492_v3 = vpop.f32.mrf.mxu2 }
  0xb1   :  { %v481_v2 = vpop.f32.mrf.mxu1  ;;  %v505_v4 = vpop.f32.mrf.mxu3  ;;  %v493_v10 = vadd.f32 %v492_v3, %v480_v9 }
  0xb3   :  { %v506_v11 = vadd.f32 %v505_v4, %v493_v10 }
  0xb8   :  { %v494_v7 = vpop.f32.mrf.mxu2 }
  0xb9   :  { %v507_v8 = vpop.f32.mrf.mxu3 }
  0xc8   :  { %v518_v12 = vpop.f32.mrf.mxu0 }
  0xc9   :  { %v531_v13 = vpop.f32.mrf.mxu1  ;;  %v519_v14 = vadd.f32 %v518_v12, %v506_v11 }
  0xcb   :  { %v532_v15 = vadd.f32 %v531_v13, %v519_v14 }
  0xcd   :  { %535 = vst [vmem:[#allocation7] sm:$0xff] %v532_v15 }
  0xce   :  { %546 = dma.vmem_to_hbm [thread:$0]  %s542_s25, 128, %s544_s28, [#allocation4]  }
  0xd0   :  { %v520_v16 = vpop.f32.mrf.mxu0 }
  0xd1   :  { %v533_v17 = vpop.f32.mrf.mxu1 }
  0xd2   :  { %876 = dma.done.wait [#allocation4], 128  }
  0xd3   :  { %877 = vsyncadd [#allocation4], 4294967168 }
  0xd4   :  { %551 = vsyncpa [#allocation3], 1 }
  0xd5   :  { %552 = vsyncpa [#allocation6], 1 }
  0xd6   :  { %553 = vsyncpa [#allocation4], 1 }

</bundles_post_ra>
